<compile_context>
chip_gen: v5e
topology: v5e:2x2
jax: 0.10.0
libtpu: 0.0.40
codegen_flags: <defaults>
</compile_context>

<pallas_src>
from functools import partial

import numpy as np
import jax
import jax.numpy as jnp
from jax import lax
from jax.experimental import pallas as pl
from jax.experimental.pallas import tpu as pltpu

# contract both operands on their last dim: A @ B^T  (supported "NT" matmul)
_NT_DIMS = (((1,), (1,)), ((), ()))


def _make_pcn_kernel(layers, dt, n_cycles, batch, out_width):
    s0, s_top = layers[0], layers[-1]
    S_tgt = sum(layers[:-1])      # total width of predicted (target) layers 0..L-2
    S_free = sum(layers[1:])      # total width of free (updatable) layers 1..L-1
    n_bu = S_tgt - s0             # free columns that receive a bottom-up error term
    two_dt = 2.0 * float(dt)
    pad = out_width - (s0 + 2 * s_top + 1)

    def kernel(u_ref, w_ref, b_ref, prow_ref, pcol_ref, out_ref):
        u_all = u_ref[...]                       # (B, sum(layers))
        w_bd = w_ref[...]                        # (S_tgt, S_free) block-diagonal weights
        bias = b_ref[...]                        # (B, S_tgt)
        p_row = prow_ref[...]                    # (1, S_tgt) diagonal precisions
        p_col = pcol_ref[...]                    # (S_tgt, 1) same values, column layout

        u0_fix = u_all[:, :s0]                   # fixed layer-0 observations
        u_free = u_all[:, s0:]                   # free units, carried as a value

        # hoisted loop invariants: fold 2*dt*precision into the update weights once
        w_upd = (two_dt * p_col) * w_bd          # (S_tgt, S_free)
        p2dt_bu = two_dt * p_row[:, s0:]         # (1, n_bu) bottom-up precision row
        bu_pad = jnp.zeros((batch, s_top), jnp.float32)

        def evaluate(u_free):
            a = jnp.tanh(u_free)                                          # (B, S_free)
            # all layer predictions in one NT matmul: A @ W_bd^T + bias
            pred = lax.dot_general(a, w_bd, _NT_DIMS,
                                   preferred_element_type=jnp.float32) + bias
            if n_bu:
                u_tgt = jnp.concatenate([u0_fix, u_free[:, :n_bu]], axis=1)
            else:
                u_tgt = u0_fix
            err = u_tgt - pred                                            # (B, S_tgt)
            return a, pred, err

        # statically unrolled inference cycles: n_cycles - 1 unit updates ...
        # TODO(synk): switch to lax.fori_loop carrying u_free if n_cycles grows large.
        for _ in range(n_cycles - 1):
            a, _, err = evaluate(u_free)
            # all unit-update gradients in one matmul (2*dt*precision pre-folded)
            g = jnp.dot(err, w_upd, preferred_element_type=jnp.float32)   # (B, S_free)
            upd = (1.0 - a * a) * g
            if n_bu:
                upd = upd - jnp.concatenate([p2dt_bu * err[:, s0:], bu_pad], axis=1)
            u_free = u_free + upd

        # ... then one final evaluation (no update): free energy + outputs.
        a, pred, err = evaluate(u_free)
        # PcnErrs: f = sum_layers sum(einsum('ik,ii,ik->k')) with diagonal precision
        f = jnp.sum(p_row * err * err)

        # single lane-dense (B, out_width) store: [pred0 | u_top | act_top | f | 0-pad]
        pieces = [pred[:, :s0],
                  u_free[:, S_free - s_top:],
                  a[:, S_free - s_top:],
                  jnp.zeros((batch, 1), jnp.float32) + f]
        if pad:
            pieces.append(jnp.zeros((batch, pad), jnp.float32))
        out_ref[...] = jnp.concatenate(pieces, axis=1)

    return kernel


@partial(jax.jit, static_argnames=("dt", "n_cycles"))
def _pcn_forward(u0, u_inits, Ws, bs, ps, *, dt, n_cycles):
    f32 = jnp.float32
    layers = [u0.shape[0]] + [u.shape[0] for u in u_inits]
    B = u0.shape[1]
    s0, s_top = layers[0], layers[-1]
    S_tgt, S_free = sum(layers[:-1]), sum(layers[1:])
    used = s0 + 2 * s_top + 1
    out_w = max(128, -(-used // 128) * 128)

    # boundary layout plumbing (fused under jit): pack everything into 5 slabs,
    # all lane-dense (batch, features) or feature-major for the weights.
    units_slab = jnp.concatenate(
        [u0.T.astype(f32)] + [u.T.astype(f32) for u in u_inits], axis=1)     # (B, S_all)
    bias_slab = jnp.concatenate([b.T.astype(f32) for b in bs], axis=1)       # (B, S_tgt)
    p_row = jnp.concatenate([p.T.astype(f32) for p in ps], axis=1)           # (1, S_tgt)
    p_col = jnp.concatenate([p.astype(f32) for p in ps], axis=0)             # (S_tgt, 1)
    w_slab = jnp.zeros((S_tgt, S_free), f32)                                 # block-diagonal
    r = c = 0
    for W in Ws:
        w_slab = w_slab.at[r:r + W.shape[0], c:c + W.shape[1]].set(W.astype(f32))
        r += W.shape[0]
        c += W.shape[1]

    kernel = _make_pcn_kernel(layers, dt, n_cycles, B, out_w)
    vmem = pl.BlockSpec(memory_space=pltpu.MemorySpace.VMEM)   # whole array, no grid/pipeline
    slab = pl.pallas_call(
        kernel,
        out_shape=jax.ShapeDtypeStruct((B, out_w), f32),
        in_specs=[vmem] * 5,
        out_specs=vmem,
    )(units_slab, w_slab, bias_slab, p_row, p_col)

    in_pred = slab[:, :s0].T                          # (s0, B)   last prediction of layer 0
    u_top = slab[:, s0:s0 + s_top].T                  # (s_top, B) final top-layer units
    act_top = slab[:, s0 + s_top:s0 + 2 * s_top].T    # (s_top, B) tanh(top units)
    f = slab[0, s0 + 2 * s_top]                       # scalar free energy
    return f, in_pred, u_top, act_top


def torch_pcn_forward(u0, u_inits, Ws, bs, ps, *, dt, n_cycles):
    if n_cycles < 1:
        raise ValueError("n_cycles must be >= 1")
    f, in_pred, u_top, act_top = _pcn_forward(
        u0, u_inits, Ws, bs, ps, dt=float(dt), n_cycles=int(n_cycles))
    # TorchPcn.forward returns:
    # (last_F, last_in_preds, units_layer0, units_top, act_units_top, counter)
    return f, in_pred, u0, u_top, act_top, n_cycles


def ref_forward(u0, u_inits, Ws, bs, ps, dt, n_cycles):
    """Pure-numpy (float64) reference of the forward (analytic inner SGD)."""
    units = [np.asarray(u0, np.float64)] + [np.asarray(u, np.float64) for u in u_inits]
    Ws = [np.asarray(w, np.float64) for w in Ws]
    bs = [np.asarray(b, np.float64) for b in bs]
    ps = [np.asarray(p, np.float64) for p in ps]
    L = len(units)
    f = pred0 = acts = None
    for step in range(n_cycles):
        acts = [None] + [np.tanh(units[m]) for m in range(1, L)]
        preds, errs = [], []
        f = 0.0
        for m in range(1, L):
            pred = Ws[m - 1] @ acts[m] + bs[m - 1]
            e = units[m - 1] - pred
            f += np.sum(ps[m - 1] * e * e)
            preds.append(pred)
            errs.append(e)
        pred0 = preds[0]
        if step < n_cycles - 1:
            new_units = list(units)
            for m in range(1, L):
                grad = -2.0 * (1.0 - acts[m] ** 2) * (Ws[m - 1].T @ (ps[m - 1] * errs[m - 1]))
                if m < L - 1:
                    grad = grad + 2.0 * ps[m] * errs[m]
                new_units[m] = units[m] - dt * grad
            units = new_units
    return f, pred0, units[-1], acts[L - 1]


if __name__ == "__main__":
    layers = [16, 32, 8]   # [input_dim, hidden, top]
    B = 8                  # batch_size
    dt = 0.05              # inner inference step (SGD lr on units)
    n_cycles = 6           # last_inf inference cycles

    key = jax.random.PRNGKey(0)
    k_x, k_u, k_w, k_b = jax.random.split(key, 4)

    # bottom-layer observations fed via set_units (fixed_input_activity=True)
    x = jax.random.normal(k_x, (layers[0], B), jnp.float32)

    n_free = len(layers) - 1
    ku = jax.random.split(k_u, n_free)
    kw = jax.random.split(k_w, n_free)
    kb = jax.random.split(k_b, n_free)

    gain = 5.0 / 3.0  # nn.init.calculate_gain('tanh')
    u_inits, Ws, bs = [], [], []
    for m in range(1, len(layers)):
        size, tgt = layers[m], layers[m - 1]
        # init_preds: units ~ U(0, 1)
        u_inits.append(jax.random.uniform(ku[m - 1], (size, B), jnp.float32))
        # init_params: xavier_uniform_(W, gain('tanh')),  bias ~ N(0, 1)
        limit = gain * float(np.sqrt(6.0 / (size + tgt)))
        Ws.append(jax.random.uniform(kw[m - 1], (tgt, size), jnp.float32, -limit, limit))
        bs.append(jax.random.normal(kb[m - 1], (tgt, B), jnp.float32))

    # learn_sigmas=False -> covariances are identity (layer 0 scaled by 1e6);
    # PcnErrs uses only the diagonal of the precision (einsum 'ik,ii,ik->k').
    ps = [jnp.full((layers[0], 1), 1e-6, jnp.float32)] + \
         [jnp.ones((layers[m], 1), jnp.float32) for m in range(1, len(layers) - 1)]

    f, in_preds, u0_out, u_top, act_top, counter = jax.block_until_ready(
        torch_pcn_forward(x, u_inits, Ws, bs, ps, dt=dt, n_cycles=n_cycles))

    f_ref, in_preds_ref, u_top_ref, act_top_ref = ref_forward(
        np.asarray(x), [np.asarray(u) for u in u_inits],
        [np.asarray(w) for w in Ws], [np.asarray(b) for b in bs],
        [np.asarray(p) for p in ps], dt, n_cycles)

    np.testing.assert_allclose(np.asarray(f), f_ref, rtol=2e-2, atol=1e-3)
    np.testing.assert_allclose(np.asarray(in_preds), in_preds_ref, rtol=2e-2, atol=1e-3)
    np.testing.assert_allclose(np.asarray(u_top), u_top_ref, rtol=2e-2, atol=1e-3)
    np.testing.assert_allclose(np.asarray(act_top), act_top_ref, rtol=2e-2, atol=1e-3)

    print("KERNEL_OK")
</pallas_src>

<mosaic_0001>
module attributes {stable_mosaic.version = 11 : i64} {
  func.func @kernel(%arg0: memref<8x56xf32, #tpu.memory_space<vmem>>, %arg1: memref<48x40xf32, #tpu.memory_space<vmem>>, %arg2: memref<8x48xf32, #tpu.memory_space<vmem>>, %arg3: memref<1x48xf32, #tpu.memory_space<vmem>>, %arg4: memref<48x1xf32, #tpu.memory_space<vmem>>, %arg5: memref<8x128xf32, #tpu.memory_space<vmem>>) attributes {dimension_semantics = [], scalar_prefetch = 0 : i64, scratch_operands = 0 : i64, tpu.core_type = #tpu.core_type<tc>} {
    %c0 = arith.constant 0 : index
    %c0_0 = arith.constant 0 : index
    %0 = vector.load %arg0[%c0, %c0_0] : memref<8x56xf32, #tpu.memory_space<vmem>>, vector<8x56xf32>
    %c0_1 = arith.constant 0 : index
    %c0_2 = arith.constant 0 : index
    %1 = vector.load %arg1[%c0_1, %c0_2] : memref<48x40xf32, #tpu.memory_space<vmem>>, vector<48x40xf32>
    %c0_3 = arith.constant 0 : index
    %c0_4 = arith.constant 0 : index
    %2 = vector.load %arg2[%c0_3, %c0_4] : memref<8x48xf32, #tpu.memory_space<vmem>>, vector<8x48xf32>
    %c0_5 = arith.constant 0 : index
    %c0_6 = arith.constant 0 : index
    %3 = vector.load %arg3[%c0_5, %c0_6] : memref<1x48xf32, #tpu.memory_space<vmem>>, vector<1x48xf32>
    %c0_7 = arith.constant 0 : index
    %c0_8 = arith.constant 0 : index
    %4 = vector.load %arg4[%c0_7, %c0_8] : memref<48x1xf32, #tpu.memory_space<vmem>>, vector<48x1xf32>
    %5 = vector.extract_strided_slice %0 {offsets = [0, 0], sizes = [8, 16], strides = [1, 1]} : vector<8x56xf32> to vector<8x16xf32>
    %6 = vector.extract_strided_slice %0 {offsets = [0, 16], sizes = [8, 40], strides = [1, 1]} : vector<8x56xf32> to vector<8x40xf32>
    %cst = arith.constant 1.000000e-01 : f32
    %7 = vector.broadcast %cst : f32 to vector<48x1xf32>
    %8 = arith.mulf %7, %4 : vector<48x1xf32>
    %9 = vector.broadcast %8 : vector<48x1xf32> to vector<48x40xf32>
    %10 = arith.mulf %9, %1 : vector<48x40xf32>
    %11 = vector.extract_strided_slice %3 {offsets = [0, 16], sizes = [1, 32], strides = [1, 1]} : vector<1x48xf32> to vector<1x32xf32>
    %cst_9 = arith.constant 1.000000e-01 : f32
    %12 = vector.broadcast %cst_9 : f32 to vector<1x32xf32>
    %13 = arith.mulf %12, %11 : vector<1x32xf32>
    %cst_10 = arith.constant 0.000000e+00 : f32
    %14 = vector.broadcast %cst_10 : f32 to vector<8x8xf32>
    %15 = math.tanh %6 : vector<8x40xf32>
    %cst_11 = arith.constant dense<0.000000e+00> : vector<8x48xf32>
    %16 = tpu.matmul %15, %1, %cst_11 {dimension_numbers = #tpu.dot_dimension_numbers<[1], [1], [0], [0], [0, 0, 1, 0], [], []>} : vector<8x40xf32>, vector<48x40xf32>, vector<8x48xf32> -> vector<8x48xf32>
    %17 = arith.addf %16, %2 : vector<8x48xf32>
    %18 = vector.extract_strided_slice %6 {offsets = [0, 0], sizes = [8, 32], strides = [1, 1]} : vector<8x40xf32> to vector<8x32xf32>
    %19 = tpu.concatenate %5, %18 in 1 : vector<8x16xf32>, vector<8x32xf32> -> vector<8x48xf32>
    %20 = arith.subf %19, %17 : vector<8x48xf32>
    %cst_12 = arith.constant dense<0.000000e+00> : vector<8x40xf32>
    %21 = tpu.matmul %20, %10, %cst_12 {dimension_numbers = #tpu.dot_dimension_numbers<[1], [0], [0], [1], [0, 0, 1, 1], [], []>} : vector<8x48xf32>, vector<48x40xf32>, vector<8x40xf32> -> vector<8x40xf32>
    %22 = arith.mulf %15, %15 : vector<8x40xf32>
    %cst_13 = arith.constant 1.000000e+00 : f32
    %23 = vector.broadcast %cst_13 : f32 to vector<8x40xf32>
    %24 = arith.subf %23, %22 : vector<8x40xf32>
    %25 = arith.mulf %24, %21 : vector<8x40xf32>
    %26 = vector.extract_strided_slice %20 {offsets = [0, 16], sizes = [8, 32], strides = [1, 1]} : vector<8x48xf32> to vector<8x32xf32>
    %27 = vector.broadcast %13 : vector<1x32xf32> to vector<8x32xf32>
    %28 = arith.mulf %27, %26 : vector<8x32xf32>
    %29 = tpu.concatenate %28, %14 in 1 : vector<8x32xf32>, vector<8x8xf32> -> vector<8x40xf32>
    %30 = arith.subf %25, %29 : vector<8x40xf32>
    %31 = arith.addf %6, %30 : vector<8x40xf32>
    %32 = math.tanh %31 : vector<8x40xf32>
    %cst_14 = arith.constant dense<0.000000e+00> : vector<8x48xf32>
    %33 = tpu.matmul %32, %1, %cst_14 {dimension_numbers = #tpu.dot_dimension_numbers<[1], [1], [0], [0], [0, 0, 1, 0], [], []>} : vector<8x40xf32>, vector<48x40xf32>, vector<8x48xf32> -> vector<8x48xf32>
    %34 = arith.addf %33, %2 : vector<8x48xf32>
    %35 = vector.extract_strided_slice %31 {offsets = [0, 0], sizes = [8, 32], strides = [1, 1]} : vector<8x40xf32> to vector<8x32xf32>
    %36 = tpu.concatenate %5, %35 in 1 : vector<8x16xf32>, vector<8x32xf32> -> vector<8x48xf32>
    %37 = arith.subf %36, %34 : vector<8x48xf32>
    %cst_15 = arith.constant dense<0.000000e+00> : vector<8x40xf32>
    %38 = tpu.matmul %37, %10, %cst_15 {dimension_numbers = #tpu.dot_dimension_numbers<[1], [0], [0], [1], [0, 0, 1, 1], [], []>} : vector<8x48xf32>, vector<48x40xf32>, vector<8x40xf32> -> vector<8x40xf32>
    %39 = arith.mulf %32, %32 : vector<8x40xf32>
    %cst_16 = arith.constant 1.000000e+00 : f32
    %40 = vector.broadcast %cst_16 : f32 to vector<8x40xf32>
    %41 = arith.subf %40, %39 : vector<8x40xf32>
    %42 = arith.mulf %41, %38 : vector<8x40xf32>
    %43 = vector.extract_strided_slice %37 {offsets = [0, 16], sizes = [8, 32], strides = [1, 1]} : vector<8x48xf32> to vector<8x32xf32>
    %44 = vector.broadcast %13 : vector<1x32xf32> to vector<8x32xf32>
    %45 = arith.mulf %44, %43 : vector<8x32xf32>
    %46 = tpu.concatenate %45, %14 in 1 : vector<8x32xf32>, vector<8x8xf32> -> vector<8x40xf32>
    %47 = arith.subf %42, %46 : vector<8x40xf32>
    %48 = arith.addf %31, %47 : vector<8x40xf32>
    %49 = math.tanh %48 : vector<8x40xf32>
    %cst_17 = arith.constant dense<0.000000e+00> : vector<8x48xf32>
    %50 = tpu.matmul %49, %1, %cst_17 {dimension_numbers = #tpu.dot_dimension_numbers<[1], [1], [0], [0], [0, 0, 1, 0], [], []>} : vector<8x40xf32>, vector<48x40xf32>, vector<8x48xf32> -> vector<8x48xf32>
    %51 = arith.addf %50, %2 : vector<8x48xf32>
    %52 = vector.extract_strided_slice %48 {offsets = [0, 0], sizes = [8, 32], strides = [1, 1]} : vector<8x40xf32> to vector<8x32xf32>
    %53 = tpu.concatenate %5, %52 in 1 : vector<8x16xf32>, vector<8x32xf32> -> vector<8x48xf32>
    %54 = arith.subf %53, %51 : vector<8x48xf32>
    %cst_18 = arith.constant dense<0.000000e+00> : vector<8x40xf32>
    %55 = tpu.matmul %54, %10, %cst_18 {dimension_numbers = #tpu.dot_dimension_numbers<[1], [0], [0], [1], [0, 0, 1, 1], [], []>} : vector<8x48xf32>, vector<48x40xf32>, vector<8x40xf32> -> vector<8x40xf32>
    %56 = arith.mulf %49, %49 : vector<8x40xf32>
    %cst_19 = arith.constant 1.000000e+00 : f32
    %57 = vector.broadcast %cst_19 : f32 to vector<8x40xf32>
    %58 = arith.subf %57, %56 : vector<8x40xf32>
    %59 = arith.mulf %58, %55 : vector<8x40xf32>
    %60 = vector.extract_strided_slice %54 {offsets = [0, 16], sizes = [8, 32], strides = [1, 1]} : vector<8x48xf32> to vector<8x32xf32>
    %61 = vector.broadcast %13 : vector<1x32xf32> to vector<8x32xf32>
    %62 = arith.mulf %61, %60 : vector<8x32xf32>
    %63 = tpu.concatenate %62, %14 in 1 : vector<8x32xf32>, vector<8x8xf32> -> vector<8x40xf32>
    %64 = arith.subf %59, %63 : vector<8x40xf32>
    %65 = arith.addf %48, %64 : vector<8x40xf32>
    %66 = math.tanh %65 : vector<8x40xf32>
    %cst_20 = arith.constant dense<0.000000e+00> : vector<8x48xf32>
    %67 = tpu.matmul %66, %1, %cst_20 {dimension_numbers = #tpu.dot_dimension_numbers<[1], [1], [0], [0], [0, 0, 1, 0], [], []>} : vector<8x40xf32>, vector<48x40xf32>, vector<8x48xf32> -> vector<8x48xf32>
    %68 = arith.addf %67, %2 : vector<8x48xf32>
    %69 = vector.extract_strided_slice %65 {offsets = [0, 0], sizes = [8, 32], strides = [1, 1]} : vector<8x40xf32> to vector<8x32xf32>
    %70 = tpu.concatenate %5, %69 in 1 : vector<8x16xf32>, vector<8x32xf32> -> vector<8x48xf32>
    %71 = arith.subf %70, %68 : vector<8x48xf32>
    %cst_21 = arith.constant dense<0.000000e+00> : vector<8x40xf32>
    %72 = tpu.matmul %71, %10, %cst_21 {dimension_numbers = #tpu.dot_dimension_numbers<[1], [0], [0], [1], [0, 0, 1, 1], [], []>} : vector<8x48xf32>, vector<48x40xf32>, vector<8x40xf32> -> vector<8x40xf32>
    %73 = arith.mulf %66, %66 : vector<8x40xf32>
    %cst_22 = arith.constant 1.000000e+00 : f32
    %74 = vector.broadcast %cst_22 : f32 to vector<8x40xf32>
    %75 = arith.subf %74, %73 : vector<8x40xf32>
    %76 = arith.mulf %75, %72 : vector<8x40xf32>
    %77 = vector.extract_strided_slice %71 {offsets = [0, 16], sizes = [8, 32], strides = [1, 1]} : vector<8x48xf32> to vector<8x32xf32>
    %78 = vector.broadcast %13 : vector<1x32xf32> to vector<8x32xf32>
    %79 = arith.mulf %78, %77 : vector<8x32xf32>
    %80 = tpu.concatenate %79, %14 in 1 : vector<8x32xf32>, vector<8x8xf32> -> vector<8x40xf32>
    %81 = arith.subf %76, %80 : vector<8x40xf32>
    %82 = arith.addf %65, %81 : vector<8x40xf32>
    %83 = math.tanh %82 : vector<8x40xf32>
    %cst_23 = arith.constant dense<0.000000e+00> : vector<8x48xf32>
    %84 = tpu.matmul %83, %1, %cst_23 {dimension_numbers = #tpu.dot_dimension_numbers<[1], [1], [0], [0], [0, 0, 1, 0], [], []>} : vector<8x40xf32>, vector<48x40xf32>, vector<8x48xf32> -> vector<8x48xf32>
    %85 = arith.addf %84, %2 : vector<8x48xf32>
    %86 = vector.extract_strided_slice %82 {offsets = [0, 0], sizes = [8, 32], strides = [1, 1]} : vector<8x40xf32> to vector<8x32xf32>
    %87 = tpu.concatenate %5, %86 in 1 : vector<8x16xf32>, vector<8x32xf32> -> vector<8x48xf32>
    %88 = arith.subf %87, %85 : vector<8x48xf32>
    %cst_24 = arith.constant dense<0.000000e+00> : vector<8x40xf32>
    %89 = tpu.matmul %88, %10, %cst_24 {dimension_numbers = #tpu.dot_dimension_numbers<[1], [0], [0], [1], [0, 0, 1, 1], [], []>} : vector<8x48xf32>, vector<48x40xf32>, vector<8x40xf32> -> vector<8x40xf32>
    %90 = arith.mulf %83, %83 : vector<8x40xf32>
    %cst_25 = arith.constant 1.000000e+00 : f32
    %91 = vector.broadcast %cst_25 : f32 to vector<8x40xf32>
    %92 = arith.subf %91, %90 : vector<8x40xf32>
    %93 = arith.mulf %92, %89 : vector<8x40xf32>
    %94 = vector.extract_strided_slice %88 {offsets = [0, 16], sizes = [8, 32], strides = [1, 1]} : vector<8x48xf32> to vector<8x32xf32>
    %95 = vector.broadcast %13 : vector<1x32xf32> to vector<8x32xf32>
    %96 = arith.mulf %95, %94 : vector<8x32xf32>
    %97 = tpu.concatenate %96, %14 in 1 : vector<8x32xf32>, vector<8x8xf32> -> vector<8x40xf32>
    %98 = arith.subf %93, %97 : vector<8x40xf32>
    %99 = arith.addf %82, %98 : vector<8x40xf32>
    %100 = math.tanh %99 : vector<8x40xf32>
    %cst_26 = arith.constant dense<0.000000e+00> : vector<8x48xf32>
    %101 = tpu.matmul %100, %1, %cst_26 {dimension_numbers = #tpu.dot_dimension_numbers<[1], [1], [0], [0], [0, 0, 1, 0], [], []>} : vector<8x40xf32>, vector<48x40xf32>, vector<8x48xf32> -> vector<8x48xf32>
    %102 = arith.addf %101, %2 : vector<8x48xf32>
    %103 = vector.extract_strided_slice %99 {offsets = [0, 0], sizes = [8, 32], strides = [1, 1]} : vector<8x40xf32> to vector<8x32xf32>
    %104 = tpu.concatenate %5, %103 in 1 : vector<8x16xf32>, vector<8x32xf32> -> vector<8x48xf32>
    %105 = arith.subf %104, %102 : vector<8x48xf32>
    %106 = vector.broadcast %3 : vector<1x48xf32> to vector<8x48xf32>
    %107 = arith.mulf %106, %105 : vector<8x48xf32>
    %108 = arith.mulf %107, %105 : vector<8x48xf32>
    %109 = vector.shape_cast %108 : vector<8x48xf32> to vector<1x8x48xf32>
    %cst_27 = arith.constant dense<0.000000e+00> : vector<1xf32>
    %110 = vector.multi_reduction <add>, %109, %cst_27 [1, 2] : vector<1x8x48xf32> to vector<1xf32>
    %111 = vector.shape_cast %110 : vector<1xf32> to vector<1x1x1xf32>
    %112 = vector.extract %111[0, 0, 0] : f32 from vector<1x1x1xf32>
    %113 = vector.extract_strided_slice %102 {offsets = [0, 0], sizes = [8, 16], strides = [1, 1]} : vector<8x48xf32> to vector<8x16xf32>
    %114 = vector.extract_strided_slice %99 {offsets = [0, 32], sizes = [8, 8], strides = [1, 1]} : vector<8x40xf32> to vector<8x8xf32>
    %115 = vector.extract_strided_slice %100 {offsets = [0, 32], sizes = [8, 8], strides = [1, 1]} : vector<8x40xf32> to vector<8x8xf32>
    %cst_28 = arith.constant 0.000000e+00 : f32
    %116 = vector.broadcast %cst_28 : f32 to vector<8x1xf32>
    %117 = vector.broadcast %112 : f32 to vector<8x1xf32>
    %118 = arith.addf %116, %117 : vector<8x1xf32>
    %cst_29 = arith.constant 0.000000e+00 : f32
    %119 = vector.broadcast %cst_29 : f32 to vector<8x95xf32>
    %120 = tpu.concatenate %113, %114, %115, %118, %119 in 1 : vector<8x16xf32>, vector<8x8xf32>, vector<8x8xf32>, vector<8x1xf32>, vector<8x95xf32> -> vector<8x128xf32>
    %c0_30 = arith.constant 0 : index
    %c0_31 = arith.constant 0 : index
    %121 = vector.load %arg5[%c0_30, %c0_31] : memref<8x128xf32, #tpu.memory_space<vmem>>, vector<8x128xf32>
    tpu.vector_store %arg5[%c0_30, %c0_31], %120 {strides = array<i32>} : memref<8x128xf32, #tpu.memory_space<vmem>>, vector<8x128xf32>,
    return
  }
}

</mosaic_0001>

<bundles_post_ra>
// kernel: _pcn_forward.1
= control target key start
LH: loop header
LB: loop body
LE: loop exit
PB: predicated region body
PF: predicated region fallthrough
CT: control target
= control target key end

     0   :  { %vm82_vm0 = vcmask 326656   ;;  %v585_v1 = vmov 0   ;;  %s586_s6 = smov 112   ;;  %vm124_vm1 = vcmask 392192   ;;  %vm163_vm2 = vcmask 261120   ;;  %s588_s21 = smov 96   ;;  %s836_s0 = inlined_call_operand.vmem [shape: f32[8,56], index: 0, kind: input, shape index: {}]   ;;  %s837_s4 = inlined_call_operand.vmem [shape: f32[48,1], index: 4, kind: input, shape index: {}]   ;;  %s838_s1 = inlined_call_operand.vmem [shape: f32[48,40], index: 1, kind: input, shape index: {}]   ;;  %s839_s3 = inlined_call_operand.vmem [shape: f32[1,48], index: 3, kind: input, shape index: {}]   ;;  %s840_s2 = inlined_call_operand.vmem [shape: f32[8,48], index: 2, kind: input, shape index: {}]   ;;  %s841_s5 = inlined_call_operand.vmem [shape: f32[8,128], index: 5, kind: output, shape index: {}]  }
   0x1   :  { %v623_v0 = vld [vmem:[%s836_s0] sm:$0xff]  ;;  %570 = vset.pattern.permute.xlu1 %v585_v1  ;;  %569 = vset.pattern.permute.xlu0 %v585_v1  ;;  %v632_v4 = vld [vmem:[%s838_s1 + $0x28] sm:$0xff]  ;;  %v32_v6 = vld [vmem:[%s837_s4 + $0x18] sm:$0xff]  ;;  %vm197_vm3 = vcmask 130048   ;;  %s589_s22 = smov 104   ;;  %vm505_vm4 = vcmask 195584  }
   0x2   :  { %v33_v2 = vld [vmem:[%s837_s4 + $0x20] sm:$0xff]  ;;  %573 = vtanh.f32 %v623_v0  ;;  %571 = vset.pattern.permute.xlu2 %v585_v1  ;;  %515 = vmatpush.xpose.msk.msra.mxu0 %vm82_vm0, %v632_v4  ;;  %v31_v7 = vld [vmem:[%s837_s4 + $0x10] sm:$0xff]  ;;  %v38_v10 = vmul.f32 0.1, %v32_v6  ;;  %v658_v11 = vld [vmem:[%s838_s1 + $0x18] sm:$0xff]  ;;  %vm508_vm5 = vcmask 269312  }
   0x3   :  { %v39_v3 = vmul.f32 0.1, %v33_v2  ;;  %523 = vmatpush.xpose.msk.msra.mxu2 %vm82_vm0, %v632_v4  ;;  %v641_v5 = vld [vmem:[%s838_s1 + $0x20] sm:$0xff]  ;;  %v37_v8 = vmul.f32 0.1, %v31_v7  ;;  %v34_v12 = vld [vmem:[%s837_s4 + $0x28] sm:$0xff] }
   0x4   :  { %v672_v13 = vld [vmem:[%s838_s1 + $0x10] sm:$0xff]  ;;  %v40_v14 = vmul.f32 0.1, %v34_v12  ;;  %v29_v15 = vld [vmem:[%s837_s4] sm:$0xff]  ;;  %v684_v17 = vld [vmem:[%s838_s1 + $0x8] sm:$0xff] }
   0x5   :  { %63 = vperm.xlu1 %570, %v39_v3   ;;  %53 = vperm.xlu2 %571, %v37_v8   ;;  %v35_v16 = vmul.f32 0.1, %v29_v15  ;;  %v693_v18 = vld [vmem:[%s838_s1] sm:$0xff]  ;;  %v30_v19 = vld [vmem:[%s837_s4 + $0x8] sm:$0xff] }
   0x6   :  { %516 = vmatpush.xpose.msk.msra.mxu0 %vm82_vm0, %v641_v5  ;;  %v36_v20 = vmul.f32 0.1, %v30_v19  ;;  %v28_v34 = vld [vmem:[%s839_s3] sm:$0x1] }
   0x7   :  { %524 = vmatpush.xpose.msk.msra.mxu2 %vm82_vm0, %v641_v5  ;;  %v77_v35 = vmul.f32 0.1, %v28_v34  ;;  %v739_v36 = vld [vmem:[%s840_s2] sm:$0xff]  ;;  %s587_s2 = smov 16  }
   0x8   :  { %v653_v9 = vpop.eup %573 }
   0x9   :  { %80 = vrot.lane.b32.xlu0 %v653_v9, %s586_s6  ;;  %v742_v39 = vperm.slane %v77_v35, 0  ;;  %v148_v45 = vmul.f32 %v653_v9, %v653_v9 }
   0xa   :  { %517 = vmatpush.xpose.msk.msra.mxu0 %vm82_vm0, %v658_v11 }
   0xb   :  { %525 = vmatpush.xpose.msk.msra.mxu2 %vm82_vm0, %v658_v11  ;;  %v149_v46 = vsub.f32 1.0, %v148_v45 }
   0xd   :  { %58 = vperm.xlu1 %570, %v38_v10   ;;  %48 = vperm.xlu2 %571, %v36_v20  }
   0xe   :  { %518 = vmatpush.xpose.msk.msra.mxu0 %vm82_vm0, %v672_v13 }
   0xf   :  { %526 = vmatpush.xpose.msk.msra.mxu2 %vm82_vm0, %v672_v13 }
  0x11   :  { %68 = vperm.xlu0 %569, %v40_v14  }
  0x12   :  { %519 = vmatpush.xpose.msk.msra.mxu0 %vm82_vm0, %v684_v17 }
  0x13   :  { %527 = vmatpush.xpose.msk.msra.mxu2 %vm82_vm0, %v684_v17 }
  0x15   :  { %43 = vperm.xlu1 %570, %v35_v16  }
  0x16   :  { %520 = vmatpush.xpose.msk.msra.mxu0 %vm82_vm0, %v693_v18 }
  0x17   :  { %528 = vmatpush.xpose.msk.msra.mxu2 %vm82_vm0, %v693_v18 }
  0x1a   :  { %539 = vmatpush.xpose.msk.msrb.mxu0 %vm82_vm0, %v632_v4 }
  0x1e   :  { %540 = vmatpush.xpose.msk.msrb.mxu0 %vm82_vm0, %v641_v5 }
  0x22   :  { %541 = vmatpush.xpose.msk.msrb.mxu0 %vm82_vm0, %v658_v11 }
  0x26   :  { %542 = vmatpush.xpose.msk.msrb.mxu0 %vm82_vm0, %v672_v13 }
  0x2a   :  { %543 = vmatpush.xpose.msk.msrb.mxu0 %vm82_vm0, %v684_v17 }
  0x2e   :  { %544 = vmatpush.xpose.msk.msrb.mxu0 %vm82_vm0, %v693_v18 }
  0x5f   :  { %v54_v28 = vpop.permute.xlu2 %53 }
  0x60   :  { %v73_v29 = vmul.f32 %v54_v28, %v672_v13 }
  0x67   :  { %v49_v31 = vpop.permute.xlu2 %48 }
  0x68   :  { %v72_v32 = vmul.f32 %v49_v31, %v684_v17 }
  0x77   :  { %v64_v22 = vpop.permute.xlu1 %63 }
  0x78   :  { %v75_v24 = vmul.f32 %v64_v22, %v641_v5 }
  0x7b   :  { %v81_v21 = vpop.permute.xlu0 %80 }
  0x7c   :  { %521 = vmatmul.msk.f32.vlgmr.msra.gmra.mxu0 %vm82_vm0, %v81_v21 }
  0x7f   :  { %v59_v26 = vpop.permute.xlu1 %58 }
  0x80   :  { %v74_v27 = vmul.f32 %v59_v26, %v658_v11 }
  0x83   :  { %v69_v23 = vpop.permute.xlu0 %68 }
  0x84   :  { %v76_v25 = vmul.f32 %v69_v23, %v632_v4 }
  0x86   :  { %213 = vmatpush.msra.mxu3 %v76_v25  ;;  %138 = vmatpush.msra.mxu1 %v76_v25 }
  0x87   :  { %353 = vmatpush.msrb.mxu2 %v76_v25  ;;  %v44_v30 = vpop.permute.xlu1 %43 }
  0x88   :  { %214 = vmatpush.msra.mxu3 %v75_v24  ;;  %139 = vmatpush.msra.mxu1 %v75_v24  ;;  %v71_v33 = vmul.f32 %v44_v30, %v693_v18 }
  0x89   :  { %354 = vmatpush.msrb.mxu2 %v75_v24 }
  0x8a   :  { %215 = vmatpush.msra.mxu3 %v74_v27  ;;  %140 = vmatpush.msra.mxu1 %v74_v27 }
  0x8b   :  { %355 = vmatpush.msrb.mxu2 %v74_v27 }
  0x8c   :  { %216 = vmatpush.msra.mxu3 %v73_v29  ;;  %141 = vmatpush.msra.mxu1 %v73_v29 }
  0x8d   :  { %356 = vmatpush.msrb.mxu2 %v73_v29 }
  0x8e   :  { %217 = vmatpush.msra.mxu3 %v72_v32  ;;  %142 = vmatpush.msra.mxu1 %v72_v32 }
  0x8f   :  { %357 = vmatpush.msrb.mxu2 %v72_v32 }
  0x90   :  { %218 = vmatpush.msra.mxu3 %v71_v33  ;;  %143 = vmatpush.msra.mxu1 %v71_v33 }
  0x91   :  { %358 = vmatpush.msrb.mxu2 %v71_v33 }
  0x92   :  { %283 = vmatpush.msrb.mxu3 %v76_v25  ;;  %531 = vmatpush.xpose.msk.msrb.mxu1 %vm82_vm0, %v632_v4 }
  0x94   :  { %284 = vmatpush.msrb.mxu3 %v75_v24 }
  0x96   :  { %285 = vmatpush.msrb.mxu3 %v74_v27  ;;  %532 = vmatpush.xpose.msk.msrb.mxu1 %vm82_vm0, %v641_v5 }
  0x98   :  { %286 = vmatpush.msrb.mxu3 %v73_v29 }
  0x9a   :  { %287 = vmatpush.msrb.mxu3 %v72_v32  ;;  %533 = vmatpush.xpose.msk.msrb.mxu1 %vm82_vm0, %v658_v11 }
  0x9c   :  { %288 = vmatpush.msrb.mxu3 %v71_v33 }
  0x9e   :  { %534 = vmatpush.xpose.msk.msrb.mxu1 %vm82_vm0, %v672_v13 }
  0xa2   :  { %535 = vmatpush.xpose.msk.msrb.mxu1 %vm82_vm0, %v684_v17 }
  0xa6   :  { %536 = vmatpush.xpose.msk.msrb.mxu1 %vm82_vm0, %v693_v18 }
  0xf9   :  { %v120_v37 = vpop.f32.mrf.mxu0 }
  0xfa   :  { %v121_v38 = vadd.f32 %v120_v37, %v739_v36 }
  0xfc   :  { %v123_v40 = vsub.f32 %v623_v0, %v121_v38 }
  0xfe   :  { %522 = vmatmul.msk.f32.vlgmr.msra.gmra.mxu1 %vm124_vm1, %v123_v40  ;;  %v158_v41 = vmul.f32 %v742_v39, %v123_v40 }
  0xff   :  { %423 = vmatpush.msra.mxu1 %v76_v25 }
 0x100   :  { %160 = vrot.lane.b32.xlu2 %v158_v41, %s586_s6 }
 0x101   :  { %424 = vmatpush.msra.mxu1 %v75_v24 }
 0x103   :  { %425 = vmatpush.msra.mxu1 %v74_v27 }
 0x105   :  { %426 = vmatpush.msra.mxu1 %v73_v29 }
 0x107   :  { %427 = vmatpush.msra.mxu1 %v72_v32 }
 0x109   :  { %428 = vmatpush.msra.mxu1 %v71_v33 }
 0x15a   :  { %v161_v42 = vpop.permute.xlu2 %160 }
 0x15b   :  { %v164_v43 = vsel %vm163_vm2, %v161_v42, 0.0 }
 0x15c   :  { %166 = vrot.lane.b32.xlu1 %v164_v43, %s587_s2 }
 0x17b   :  { %v145_v44 = vpop.f32.mrf.mxu1 }
 0x17c   :  { %151 = vrot.lane.b32.xlu0 %v145_v44, %s587_s2 }
 0x1ce   :  { %v167_v49 = vpop.permute.xlu1 %166 }
 0x1ee   :  { %v152_v47 = vpop.permute.xlu0 %151 }
 0x1ef   :  { %v154_v48 = vmul.f32 %v152_v47, %v149_v46 }
 0x1f1   :  { %v169_v50 = vsub.f32 %v154_v48, %v167_v49 }
 0x1f3   :  { %v170_v51 = vadd.f32 %v169_v50, %v623_v0 }
 0x1f5   :  { %575 = vtanh.f32 %v170_v51  ;;  %v198_v56 = vsel %vm197_vm3, %v623_v0, %v170_v51 }
 0x1fb   :  { %v576_v52 = vpop.eup %575 }
 0x1fc   :  { %173 = vrot.lane.b32.xlu2 %v576_v52, %s586_s6  ;;  %v223_v62 = vmul.f32 %v576_v52, %v576_v52 }
 0x1fe   :  { %v224_v63 = vsub.f32 1.0, %v223_v62  ;;  %v572_v62 = vld [vmem:[%s839_s3] ss:$0 sm:$0xff] }
 0x256   :  { %v174_v53 = vpop.permute.xlu2 %173 }
 0x257   :  { %529 = vmatmul.msk.f32.vlgmr.msra.gmra.mxu2 %vm82_vm0, %v174_v53 }
 0x258   :  { %555 = vmatpush.xpose.msk.msra.mxu2 %vm82_vm0, %v632_v4 }
 0x25c   :  { %556 = vmatpush.xpose.msk.msra.mxu2 %vm82_vm0, %v641_v5 }
 0x260   :  { %557 = vmatpush.xpose.msk.msra.mxu2 %vm82_vm0, %v658_v11 }
 0x264   :  { %558 = vmatpush.xpose.msk.msra.mxu2 %vm82_vm0, %v672_v13 }
 0x268   :  { %559 = vmatpush.xpose.msk.msra.mxu2 %vm82_vm0, %v684_v17 }
 0x26c   :  { %560 = vmatpush.xpose.msk.msra.mxu2 %vm82_vm0, %v693_v18 }
 0x2da   :  { %v194_v54 = vpop.f32.mrf.mxu2 }
 0x2db   :  { %v195_v55 = vadd.f32 %v194_v54, %v739_v36 }
 0x2dd   :  { %v199_v57 = vsub.f32 %v198_v56, %v195_v55 }
 0x2df   :  { %530 = vmatmul.msk.f32.vlgmr.msra.gmra.mxu3 %vm124_vm1, %v199_v57  ;;  %v230_v58 = vmul.f32 %v199_v57, %v742_v39 }
 0x2e0   :  { %547 = vmatpush.xpose.msk.msra.mxu3 %vm82_vm0, %v632_v4 }
 0x2e1   :  { %232 = vrot.lane.b32.xlu0 %v230_v58, %s586_s6 }
 0x2e4   :  { %548 = vmatpush.xpose.msk.msra.mxu3 %vm82_vm0, %v641_v5 }
 0x2e8   :  { %549 = vmatpush.xpose.msk.msra.mxu3 %vm82_vm0, %v658_v11 }
 0x2ec   :  { %550 = vmatpush.xpose.msk.msra.mxu3 %vm82_vm0, %v672_v13 }
 0x2f0   :  { %551 = vmatpush.xpose.msk.msra.mxu3 %vm82_vm0, %v684_v17 }
 0x2f4   :  { %552 = vmatpush.xpose.msk.msra.mxu3 %vm82_vm0, %v693_v18 }
 0x353   :  { %v233_v59 = vpop.permute.xlu0 %232 }
 0x354   :  { %v235_v60 = vsel %vm163_vm2, %v233_v59, 0.0 }
 0x355   :  { %237 = vrot.lane.b32.xlu2 %v235_v60, %s587_s2 }
 0x362   :  { %v220_v61 = vpop.f32.mrf.mxu3 }
 0x363   :  { %226 = vrot.lane.b32.xlu1 %v220_v61, %s587_s2 }
 0x3af   :  { %v238_v3 = vpop.permute.xlu2 %237 }
 0x3d5   :  { %v227_v1 = vpop.permute.xlu1 %226 }
 0x3d6   :  { %v229_v2 = vmul.f32 %v227_v1, %v224_v63 }
 0x3d8   :  { %v240_v4 = vsub.f32 %v229_v2, %v238_v3 }
 0x3da   :  { %v241_v5 = vadd.f32 %v240_v4, %v170_v51 }
 0x3dc   :  { %577 = vtanh.f32 %v241_v5  ;;  %v268_v10 = vsel %vm197_vm3, %v623_v0, %v241_v5 }
 0x3e2   :  { %v578_v6 = vpop.eup %577 }
 0x3e3   :  { %244 = vrot.lane.b32.xlu0 %v578_v6, %s586_s6  ;;  %v293_v16 = vmul.f32 %v578_v6, %v578_v6 }
 0x3e5   :  { %v294_v18 = vsub.f32 1.0, %v293_v16 }
 0x455   :  { %v245_v7 = vpop.permute.xlu0 %244 }
 0x456   :  { %537 = vmatmul.msk.f32.vlgmr.msrb.gmra.mxu1 %vm82_vm0, %v245_v7 }
 0x4d3   :  { %v265_v8 = vpop.f32.mrf.mxu1 }
 0x4d4   :  { %v266_v9 = vadd.f32 %v265_v8, %v739_v36 }
 0x4d6   :  { %v269_v11 = vsub.f32 %v268_v10, %v266_v9 }
 0x4d8   :  { %538 = vmatmul.msk.f32.vlgmr.msrb.gmra.mxu3 %vm124_vm1, %v269_v11  ;;  %v300_v12 = vmul.f32 %v269_v11, %v742_v39 }
 0x4da   :  { %302 = vrot.lane.b32.xlu1 %v300_v12, %s586_s6 }
 0x54c   :  { %v303_v13 = vpop.permute.xlu1 %302 }
 0x54d   :  { %v305_v14 = vsel %vm163_vm2, %v303_v13, 0.0 }
 0x54e   :  { %307 = vrot.lane.b32.xlu0 %v305_v14, %s587_s2 }
 0x55b   :  { %v290_v15 = vpop.f32.mrf.mxu3 }
 0x55c   :  { %296 = vrot.lane.b32.xlu2 %v290_v15, %s587_s2 }
 0x5b6   :  { %v297_v17 = vpop.permute.xlu2 %296 }
 0x5b7   :  { %v299_v19 = vmul.f32 %v297_v17, %v294_v18 }
 0x5c0   :  { %v308_v20 = vpop.permute.xlu0 %307 }
 0x5c1   :  { %v310_v21 = vsub.f32 %v299_v19, %v308_v20 }
 0x5c3   :  { %v311_v22 = vadd.f32 %v310_v21, %v241_v5 }
 0x5c5   :  { %579 = vtanh.f32 %v311_v22  ;;  %v338_v27 = vsel %vm197_vm3, %v623_v0, %v311_v22 }
 0x5cb   :  { %v580_v23 = vpop.eup %579 }
 0x5cc   :  { %314 = vrot.lane.b32.xlu1 %v580_v23, %s586_s6  ;;  %v363_v33 = vmul.f32 %v580_v23, %v580_v23 }
 0x5ce   :  { %v364_v34 = vsub.f32 1.0, %v363_v33 }
 0x63e   :  { %v315_v24 = vpop.permute.xlu1 %314 }
 0x63f   :  { %545 = vmatmul.msk.f32.vlgmr.msrb.gmra.mxu0 %vm82_vm0, %v315_v24 }
 0x6bc   :  { %v335_v25 = vpop.f32.mrf.mxu0 }
 0x6bd   :  { %v336_v26 = vadd.f32 %v335_v25, %v739_v36 }
 0x6bf   :  { %v339_v28 = vsub.f32 %v338_v27, %v336_v26 }
 0x6c1   :  { %546 = vmatmul.msk.f32.vlgmr.msrb.gmra.mxu2 %vm124_vm1, %v339_v28  ;;  %v370_v29 = vmul.f32 %v339_v28, %v742_v39 }
 0x6c3   :  { %372 = vrot.lane.b32.xlu2 %v370_v29, %s586_s6 }
 0x71d   :  { %v373_v30 = vpop.permute.xlu2 %372 }
 0x71e   :  { %v375_v31 = vsel %vm163_vm2, %v373_v30, 0.0 }
 0x71f   :  { %377 = vrot.lane.b32.xlu1 %v375_v31, %s587_s2 }
 0x744   :  { %v360_v32 = vpop.f32.mrf.mxu2 }
 0x745   :  { %366 = vrot.lane.b32.xlu0 %v360_v32, %s587_s2 }
 0x791   :  { %v378_v38 = vpop.permute.xlu1 %377 }
 0x7b7   :  { %v367_v35 = vpop.permute.xlu0 %366 }
 0x7b8   :  { %v369_v37 = vmul.f32 %v367_v35, %v364_v34 }
 0x7ba   :  { %v380_v40 = vsub.f32 %v369_v37, %v378_v38 }
 0x7bc   :  { %v381_v41 = vadd.f32 %v380_v40, %v311_v22 }
 0x7be   :  { %581 = vtanh.f32 %v381_v41  ;;  %v408_v46 = vsel %vm197_vm3, %v623_v0, %v381_v41 }
 0x7c4   :  { %v582_v42 = vpop.eup %581 }
 0x7c5   :  { %384 = vrot.lane.b32.xlu2 %v582_v42, %s586_s6  ;;  %v433_v52 = vmul.f32 %v582_v42, %v582_v42 }
 0x7c7   :  { %v434_v53 = vsub.f32 1.0, %v433_v52 }
 0x81f   :  { %v385_v43 = vpop.permute.xlu2 %384 }
 0x820   :  { %553 = vmatmul.msk.f32.vlgmr.msra.gmra.mxu3 %vm82_vm0, %v385_v43 }
 0x8a3   :  { %v405_v44 = vpop.f32.mrf.mxu3 }
 0x8a4   :  { %v406_v45 = vadd.f32 %v405_v44, %v739_v36 }
 0x8a6   :  { %v409_v47 = vsub.f32 %v408_v46, %v406_v45 }
 0x8a8   :  { %554 = vmatmul.msk.f32.vlgmr.msra.gmra.mxu1 %vm124_vm1, %v409_v47  ;;  %v440_v48 = vmul.f32 %v409_v47, %v742_v39 }
 0x8aa   :  { %442 = vrot.lane.b32.xlu0 %v440_v48, %s586_s6 }
 0x91c   :  { %v443_v49 = vpop.permute.xlu0 %442 }
 0x91d   :  { %v445_v50 = vsel %vm163_vm2, %v443_v49, 0.0 }
 0x91e   :  { %447 = vrot.lane.b32.xlu2 %v445_v50, %s587_s2 }
 0x925   :  { %v430_v51 = vpop.f32.mrf.mxu1 }
 0x926   :  { %436 = vrot.lane.b32.xlu1 %v430_v51, %s587_s2 }
 0x978   :  { %v448_v56 = vpop.permute.xlu2 %447 }
 0x998   :  { %v437_v54 = vpop.permute.xlu1 %436 }
 0x999   :  { %v439_v55 = vmul.f32 %v437_v54, %v434_v53 }
 0x99b   :  { %v450_v57 = vsub.f32 %v439_v55, %v448_v56 }
 0x99d   :  { %v451_v58 = vadd.f32 %v450_v57, %v381_v41 }
 0x99f   :  { %498 = vrot.lane.b32.xlu2 %v451_v58, %s588_s21  ;;  %583 = vtanh.f32 %v451_v58  ;;  %v478_v63 = vsel %vm197_vm3, %v623_v0, %v451_v58 }
 0x9a5   :  { %v584_v39 = vpop.eup %583 }
 0x9a6   :  { %454 = vrot.lane.b32.xlu0 %v584_v39, %s586_s6 }
 0x9ae   :  { %501 = vrot.lane.b32.xlu0 %v584_v39, %s589_s22 }
 0x9f9   :  { %v499_v11 = vpop.permute.xlu2 %498 }
 0xa18   :  { %v455_v59 = vpop.permute.xlu0 %454 }
 0xa19   :  { %561 = vmatmul.msk.f32.vlgmr.msra.gmra.mxu2 %vm82_vm0, %v455_v59 }
 0xa20   :  { %v502_v13 = vpop.permute.xlu0 %501 }
 0xa9c   :  { %v475_v60 = vpop.f32.mrf.mxu2 }
 0xa9d   :  { %v476_v61 = vadd.f32 %v475_v60, %v739_v36 }
 0xa9f   :  { %v479_v1 = vsub.f32 %v478_v63, %v476_v61  ;;  %v504_v12 = vsel %vm197_vm3, %v476_v61, %v499_v11 }
 0xaa0   :  { %v506_v14 = vsel %vm505_vm4, %v504_v12, %v502_v13 }
 0xaa1   :  { %v483_v2 = vmul.f32 %v572_v62, %v479_v1 }
 0xaa3   :  { %v484_v3 = vmul.f32 %v483_v2, %v479_v1 }
 0xaa5   :  { %v485_v4 = vsel %vm124_vm1, %v484_v3, 0.0 }
 0xaa6   :  { %486 = vadd.xlane.f32.xlu1 %v485_v4 }
 0xb19   :  { %v487_v5 = vpop.xlane.xlu1 %486 }
 0xb1a   :  { %v488_v6 = vrot.slane %v487_v5, 4 }
 0xb1c   :  { %v489_v7 = vadd.f32 %v488_v6, %v487_v5 }
 0xb1e   :  { %v490_v8 = vrot.slane %v489_v7, 2 }
 0xb20   :  { %v491_v9 = vadd.f32 %v490_v8, %v489_v7 }
 0xb22   :  { %v492_v10 = vrot.slane %v491_v9, 1 }
 0xb24   :  { %v493_v36 = vadd.f32 %v492_v10, %v491_v9 }
 0xb26   :  { %562 = vpush %v493_v36 }
 0xb57   :  { %s563_s3 = spop %562 }
 0xb58   :  { %v495_v0 = vstv %s563_s3 }
 0xb59   :  { %v507_v15 = vsel %vm163_vm2, %v506_v14, %v495_v0 }
 0xb5a   :  { %v509_v16 = vsel %vm508_vm5, %v507_v15, 0.0 }
 0xb5b   :  { %510 = vst [vmem:[%s841_s5] sm:$0xff] %v509_v16 }

</bundles_post_ra>
